<compile_context>
chip_gen: v7x
topology: tpu7x:2x2x1
jax: 0.10.0
libtpu: 0.0.40
codegen_flags: <defaults>
</compile_context>

<pallas_src>
import jax
import jax.numpy as jnp
from jax.experimental import pallas as pl
from jax.experimental.pallas import tpu as pltpu


def _round_up(x, m):
    return (x + m - 1) // m * m


def _ppo_kernel(state_ref, wfc_ref, bfc_ref, wh_ref, bh_ref, out_ref):
    # hidden = relu(state @ W_fc + b_fc)
    #   bf16 MXU feed, f32 accumulation; bias-add / ReLU in f32 on the VPU.
    x = jnp.dot(state_ref[...], wfc_ref[...], preferred_element_type=jnp.float32)
    x = jnp.maximum(x + bfc_ref[...], 0.0)

    # fused heads: one matmul producing [TB, OUT_pad] = [logits | value | 0-pad]
    y = jnp.dot(x, wh_ref[...], preferred_element_type=jnp.float32)
    out_ref[...] = (y + bh_ref[...]).astype(out_ref.dtype)


def ppo_actor_critic_forward(state, params, *, block_b=1024):
    """Pallas implementation of PPOActorCritic.forward.

    state: [B, state_dim] float32
    params: dict with keys w_fc [S,64], b_fc [1,64], w_p [64,A], b_p [1,A],
            w_v [64,1], b_v [1,1]
    returns: (logits [B, A], value [B, 1]), float32
    """
    B, S = state.shape
    H = params["w_fc"].shape[1]
    A = params["w_p"].shape[1]
    OUT = _round_up(A + 1, 128)  # lane-dense fused-head output width

    # --- wrapper-side fusion / padding (pure XLA plumbing) -------------------
    w_heads = jnp.concatenate([params["w_p"], params["w_v"]], axis=1)     # [H, A+1]
    w_heads = jnp.pad(w_heads, ((0, 0), (0, OUT - (A + 1))))              # [H, OUT]
    b_heads = jnp.concatenate([params["b_p"], params["b_v"]], axis=1)     # [1, A+1]
    b_heads = jnp.pad(b_heads, ((0, 0), (0, OUT - (A + 1))))              # [1, OUT]

    # bf16 MXU feed for the first matmul (f32 accumulation inside the kernel).
    state_bf = state.astype(jnp.bfloat16)
    w_fc_bf = params["w_fc"].astype(jnp.bfloat16)
    b_fc = params["b_fc"].astype(jnp.float32)

    # --- batch tiling --------------------------------------------------------
    TB = _round_up(min(block_b, _round_up(B, 8)), 8)
    B_pad = _round_up(B, TB)
    if B_pad != B:
        state_bf = jnp.pad(state_bf, ((0, B_pad - B), (0, 0)))
    nb = B_pad // TB

    # VMEM budget: double-buffered state + output tiles, resident weights/biases.
    vmem_bytes = 2 * (TB * S * 2 + TB * OUT * 4)          # streamed tiles (x2 bufs)
    vmem_bytes += S * H * 2 + H * 4 + H * OUT * 4 + OUT * 4  # resident params
    vmem_bytes = int(min(max(2 * vmem_bytes, 4 << 20), 48 << 20))

    out = pl.pallas_call(
        _ppo_kernel,
        out_shape=jax.ShapeDtypeStruct((B_pad, OUT), jnp.float32),
        grid_spec=pltpu.PrefetchScalarGridSpec(
            num_scalar_prefetch=0,
            grid=(nb,),
            in_specs=[
                pl.BlockSpec((TB, S), lambda i: (i, 0)),    # state tile (streamed)
                pl.BlockSpec((S, H), lambda i: (0, 0)),     # fc weight (resident)
                pl.BlockSpec((1, H), lambda i: (0, 0)),     # fc bias   (resident)
                pl.BlockSpec((H, OUT), lambda i: (0, 0)),   # fused head weight
                pl.BlockSpec((1, OUT), lambda i: (0, 0)),   # fused head bias
            ],
            out_specs=pl.BlockSpec((TB, OUT), lambda i: (i, 0)),
        ),
        compiler_params=pltpu.CompilerParams(
            dimension_semantics=("parallel",),
            vmem_limit_bytes=vmem_bytes,
        ),
    )(state_bf, w_fc_bf, b_fc, w_heads, b_heads)

    logits = out[:B, :A]
    value = out[:B, A:A + 1]
    return logits, value


def init_params(key, state_dim, action_dim, hidden=64):
    """Deterministic synthetic init (PyTorch-style uniform fan_in bounds)."""
    ks = jax.random.split(key, 6)

    def lin(kw, kb, fan_in, fan_out):
        bound = 1.0 / jnp.sqrt(fan_in)
        w = jax.random.uniform(kw, (fan_in, fan_out), jnp.float32, -bound, bound)
        b = jax.random.uniform(kb, (1, fan_out), jnp.float32, -bound, bound)
        return w, b

    w_fc, b_fc = lin(ks[0], ks[1], state_dim, hidden)
    w_p, b_p = lin(ks[2], ks[3], hidden, action_dim)
    w_v, b_v = lin(ks[4], ks[5], hidden, 1)
    return {"w_fc": w_fc, "b_fc": b_fc,
            "w_p": w_p, "b_p": b_p,
            "w_v": w_v, "b_v": b_v}


def reference_forward(state, params):
    """Pure-f32 reference matching the PyTorch module."""
    x = jnp.maximum(state @ params["w_fc"] + params["b_fc"], 0.0)
    logits = x @ params["w_p"] + params["b_p"]
    value = x @ params["w_v"] + params["b_v"]
    return logits, value


if __name__ == "__main__":
    key = jax.random.PRNGKey(0)
    k_state, k_params = jax.random.split(key)

    batch, state_dim, action_dim = 8, 16, 6
    state = jax.random.normal(k_state, (batch, state_dim), jnp.float32)
    params = init_params(k_params, state_dim, action_dim)

    logits, value = jax.jit(ppo_actor_critic_forward)(state, params)
    jax.block_until_ready((logits, value))

    ref_logits, ref_value = reference_forward(state, params)
    assert logits.shape == (batch, action_dim)
    assert value.shape == (batch, 1)
    # bf16 MXU feed on the first layer -> relaxed tolerance vs the f32 reference.
    assert jnp.allclose(logits, ref_logits, atol=5e-2, rtol=5e-2)
    assert jnp.allclose(value, ref_value, atol=5e-2, rtol=5e-2)

    print("KERNEL_OK")
</pallas_src>

<mosaic_0001>
module attributes {stable_mosaic.version = 11 : i64} {
  func.func @_ppo_kernel(%arg0: i32, %arg1: memref<8x16xbf16, #tpu.memory_space<vmem>>, %arg2: memref<16x64xbf16, #tpu.memory_space<vmem>>, %arg3: memref<1x64xf32, #tpu.memory_space<vmem>>, %arg4: memref<64x128xf32, #tpu.memory_space<vmem>>, %arg5: memref<1x128xf32, #tpu.memory_space<vmem>>, %arg6: memref<8x128xf32, #tpu.memory_space<vmem>>) attributes {dimension_semantics = [#tpu.dimension_semantics<parallel>], iteration_bounds = array<i64: 1>, scalar_prefetch = 0 : i64, scratch_operands = 0 : i64, tpu.core_type = #tpu.core_type<tc>, window_params = [{transform_indices = @transform_0, window_bounds = array<i64: 8, 16>}, {pipeline_mode = #tpu.pipeline_mode<synchronous>, transform_indices = @transform_1, window_bounds = array<i64: 16, 64>}, {pipeline_mode = #tpu.pipeline_mode<synchronous>, transform_indices = @transform_2, window_bounds = array<i64: 1, 64>}, {pipeline_mode = #tpu.pipeline_mode<synchronous>, transform_indices = @transform_3, window_bounds = array<i64: 64, 128>}, {pipeline_mode = #tpu.pipeline_mode<synchronous>, transform_indices = @transform_4, window_bounds = array<i64: 1, 128>}, {transform_indices = @transform_5, window_bounds = array<i64: 8, 128>}]} {
    %c0 = arith.constant 0 : index
    %c0_0 = arith.constant 0 : index
    %0 = vector.load %arg1[%c0, %c0_0] : memref<8x16xbf16, #tpu.memory_space<vmem>>, vector<8x16xbf16>
    %c0_1 = arith.constant 0 : index
    %c0_2 = arith.constant 0 : index
    %1 = vector.load %arg2[%c0_1, %c0_2] : memref<16x64xbf16, #tpu.memory_space<vmem>>, vector<16x64xbf16>
    %cst = arith.constant dense<0.000000e+00> : vector<8x64xf32>
    %2 = tpu.matmul %0, %1, %cst {dimension_numbers = #tpu.dot_dimension_numbers<[1], [0], [0], [1], [0, 0, 1, 1], [], []>} : vector<8x16xbf16>, vector<16x64xbf16>, vector<8x64xf32> -> vector<8x64xf32>
    %c0_3 = arith.constant 0 : index
    %c0_4 = arith.constant 0 : index
    %3 = vector.load %arg3[%c0_3, %c0_4] : memref<1x64xf32, #tpu.memory_space<vmem>>, vector<1x64xf32>
    %4 = vector.broadcast %3 : vector<1x64xf32> to vector<8x64xf32>
    %5 = arith.addf %2, %4 : vector<8x64xf32>
    %cst_5 = arith.constant 0.000000e+00 : f32
    %6 = vector.broadcast %cst_5 : f32 to vector<8x64xf32>
    %7 = arith.maximumf %5, %6 : vector<8x64xf32>
    %c0_6 = arith.constant 0 : index
    %c0_7 = arith.constant 0 : index
    %8 = vector.load %arg4[%c0_6, %c0_7] : memref<64x128xf32, #tpu.memory_space<vmem>>, vector<64x128xf32>
    %cst_8 = arith.constant dense<0.000000e+00> : vector<8x128xf32>
    %9 = tpu.matmul %7, %8, %cst_8 {dimension_numbers = #tpu.dot_dimension_numbers<[1], [0], [0], [1], [0, 0, 1, 1], [], []>} : vector<8x64xf32>, vector<64x128xf32>, vector<8x128xf32> -> vector<8x128xf32>
    %c0_9 = arith.constant 0 : index
    %c0_10 = arith.constant 0 : index
    %10 = vector.load %arg5[%c0_9, %c0_10] : memref<1x128xf32, #tpu.memory_space<vmem>>, vector<1x128xf32>
    %11 = vector.broadcast %10 : vector<1x128xf32> to vector<8x128xf32>
    %12 = arith.addf %9, %11 : vector<8x128xf32>
    %c0_11 = arith.constant 0 : index
    %c0_12 = arith.constant 0 : index
    %13 = vector.load %arg6[%c0_11, %c0_12] : memref<8x128xf32, #tpu.memory_space<vmem>>, vector<8x128xf32>
    tpu.vector_store %arg6[%c0_11, %c0_12], %12 {strides = array<i32>} : memref<8x128xf32, #tpu.memory_space<vmem>>, vector<8x128xf32>,
    return
  }
  func.func @transform_0(%arg0: i32) -> (i32, i32) {
    %c0_i32 = arith.constant 0 : i32
    %c0_i32_0 = arith.constant 0 : i32
    return %arg0, %c0_i32 : i32, i32
  }
  func.func @transform_1(%arg0: i32) -> (i32, i32) {
    %c0_i32 = arith.constant 0 : i32
    %c0_i32_0 = arith.constant 0 : i32
    %c0_i32_1 = arith.constant 0 : i32
    return %c0_i32, %c0_i32_0 : i32, i32
  }
  func.func @transform_2(%arg0: i32) -> (i32, i32) {
    %c0_i32 = arith.constant 0 : i32
    %c0_i32_0 = arith.constant 0 : i32
    %c0_i32_1 = arith.constant 0 : i32
    return %c0_i32, %c0_i32_0 : i32, i32
  }
  func.func @transform_3(%arg0: i32) -> (i32, i32) {
    %c0_i32 = arith.constant 0 : i32
    %c0_i32_0 = arith.constant 0 : i32
    %c0_i32_1 = arith.constant 0 : i32
    return %c0_i32, %c0_i32_0 : i32, i32
  }
  func.func @transform_4(%arg0: i32) -> (i32, i32) {
    %c0_i32 = arith.constant 0 : i32
    %c0_i32_0 = arith.constant 0 : i32
    %c0_i32_1 = arith.constant 0 : i32
    return %c0_i32, %c0_i32_0 : i32, i32
  }
  func.func @transform_5(%arg0: i32) -> (i32, i32) {
    %c0_i32 = arith.constant 0 : i32
    %c0_i32_0 = arith.constant 0 : i32
    return %arg0, %c0_i32 : i32, i32
  }
}

</mosaic_0001>

<bundles_post_ra>
// kernel: ppo_actor_critic_forward.1
= control target key start
LH: loop header
LB: loop body
LE: loop exit
PB: predicated region body
PF: predicated region fallthrough
CT: control target
= control target key end

     0   :  { %v233_v0 = vmov 0.0   ;;  %vm234_vm0 = vmmov 0   ;;  %v235_v2 = vmov 0.0|0.0   ;;  %vm37_vm1 = vcmask 130048   ;;  %s305_s1 = inlined_call_operand.vmem [shape: bf16[16,64], index: 1, kind: input, shape index: {}]   ;;  %s306_s0 = inlined_call_operand.vmem [shape: bf16[8,16], index: 0, kind: input, shape index: {}]   ;;  %s307_s3 = inlined_call_operand.vmem [shape: f32[64,128], index: 3, kind: input, shape index: {}]   ;;  %s308_s2 = inlined_call_operand.vmem [shape: f32[1,64], index: 2, kind: input, shape index: {}]   ;;  %s309_s4 = inlined_call_operand.vmem [shape: f32[1,128], index: 4, kind: input, shape index: {}]   ;;  %s310_s5 = inlined_call_operand.vmem [shape: f32[8,128], index: 5, kind: output, shape index: {}]  }
   0x1   :  { %192 = vmatprep.subr.bf16.mxu0 %v233_v0  ;;  %v232_v1 = vld [vmem:[%s305_s1] sm:$0xff]   ;;  %194 = vmatprep.mubr.msk.bf16.mxu0 %vm234_vm0, %v233_v0  ;;  %v83_v4 = vld [vmem:[%s307_s3 + $0x8] sm:$0xff]  ;;  %v84_v7 = vld [vmem:[%s307_s3 + $0x10] sm:$0xff]  ;;  %vm97_vm2 = vcmask 523264  }
   0x2   :  { %217 = vmatprep.subr.bf16.mxu1 %v235_v2  ;;  %v82_v3 = vld [vmem:[%s307_s3] sm:$0xff]  ;;  %214 = vmatprep.mubr.msk.f32.mxu1 %vm234_vm0, %v233_v0  ;;  %v85_v8 = vld [vmem:[%s307_s3 + $0x18] sm:$0xff]  ;;  %v87_v11 = vld [vmem:[%s307_s3 + $0x28] sm:$0xff] }
   0x3   :  { %193 = vmatpush3.bf16.msra.mxu0 %v232_v1  ;;  %v21_v5 = vld [vmem:[%s306_s0] sm:$0xf]  ;;  %v218_v6 = vpack.c.bf16 %v83_v4, %v82_v3  ;;  %v221_v9 = vpack.c.bf16 %v85_v8, %v84_v7  ;;  %v88_v13 = vld [vmem:[%s307_s3 + $0x30] sm:$0xff]  ;;  %v89_v14 = vld [vmem:[%s307_s3 + $0x38] sm:$0xff] }
   0x4   :  { %v86_v10 = vld [vmem:[%s307_s3 + $0x20] sm:$0xff]  ;;  %v227_v15 = vpack.c.bf16 %v89_v14, %v88_v13 }
   0x5   :  { %219 = vmatpush3.bf16.msra.mxu1 %v218_v6  ;;  %v224_v12 = vpack.c.bf16 %v87_v11, %v86_v10  ;;  %v176_v16 = vld [vmem:[%s308_s2] ss:$0 sm:$0xff] }
   0x6   :  { %195 = vmatmul.mubr.msk.bf16.vlgmr.msra.gmra.mrb[0].mxu0 %vm37_vm1, %v21_v5  ;;  %220 = vmatprep.subr.bf16.mxu1 %v235_v2  ;;  %v179_v23 = vld [vmem:[%s309_s4] ss:$0 sm:$0xff] }
   0x9   :  { %222 = vmatpush3.bf16.msra.mxu1 %v221_v9 }
   0xa   :  { %223 = vmatprep.subr.bf16.mxu1 %v235_v2 }
   0xd   :  { %225 = vmatpush3.bf16.msra.mxu1 %v224_v12 }
   0xe   :  { %226 = vmatprep.subr.bf16.mxu1 %v235_v2 }
  0x11   :  { %228 = vmatpush3.bf16.msra.mxu1 %v227_v15 }
  0xd9   :  { %v75_v17 = vpop.f32.mrb[0].mxu0 }
  0xda   :  { %v76_v18 = vadd.f32 %v176_v16, %v75_v17  ;;  %v196_v19 = vpop.f32.mrb[1].mxu0 }
  0xdb   :  { %v78_v20 = vpop.f32.mrb[2].mxu0 }
  0xdc   :  { %v81_v21 = vmax.f32 %v76_v18, 0.0  ;;  %v197_v22 = vpop.f32.mrb[3].mxu0 }
  0xde   :  { %215 = vmatmul.mubr.msk.f32.vlgmr.msra.gmra.mrb[0].mxu1 %vm97_vm2, %v81_v21 }
 0x1b1   :  { %v167_v24 = vpop.f32.mrb[0].mxu1 }
 0x1b2   :  { %v168_v25 = vadd.f32 %v179_v23, %v167_v24  ;;  %v216_v26 = vpop.f32.mrb[1].mxu1 }
 0x1b4   :  { %171 = vst [vmem:[%s310_s5] sm:$0xff] %v168_v25 }

</bundles_post_ra>
